<compile_context>
chip_gen: v7x
topology: tpu7x:2x2x1
jax: 0.10.0
libtpu: 0.0.40
codegen_flags: <defaults>
</compile_context>

<pallas_src>
import jax
import jax.numpy as jnp
from jax.experimental import pallas as pl
from jax.experimental.pallas import tpu as pltpu


def _normalize_kernel(x_ref, scale_ref, bias_ref, o_ref):
    # x_ref: (tile_r, tile_l); scale_ref/bias_ref: (tile_r, 1) f32, broadcast
    # over lanes. Compute in f32 (free VALU slack in a memory-bound kernel),
    # cast only the final store to the output dtype.
    x = x_ref[...].astype(jnp.float32)
    o_ref[...] = (x * scale_ref[...] + bias_ref[...]).astype(o_ref.dtype)


def _tpu_tuning():
    """(target_block_bytes, vmem_limit_bytes, parallel_cores) per TPU generation."""
    try:
        kind = jax.devices()[0].device_kind.lower()
    except Exception:
        kind = ""
    if "v7" in kind or "7x" in kind:
        # 64 MiB physical VMEM, 2 TCs, ~3.2 TB/s HBM: big blocks, keep headroom.
        return 7 * 1024 * 1024, 48 * 1024 * 1024, 2
    if "v6" in kind:
        # 128 MiB physical VMEM, 1 TC, ~1.4 TB/s HBM.
        return 8 * 1024 * 1024, 64 * 1024 * 1024, 1
    if "v5" in kind:
        # ~0.82 TB/s HBM: 4 MiB blocks already put per-step overhead at a few %.
        return 4 * 1024 * 1024, 32 * 1024 * 1024, 1
    # Unknown backend: conservative defaults that are safe everywhere.
    return 4 * 1024 * 1024, 32 * 1024 * 1024, 1


def _sublane_unit(dtype):
    """Native sublane packing unit: 8 for f32, 16 for bf16/f16, 32 for int8/fp8."""
    return max(8, 32 // jnp.dtype(dtype).itemsize)


def _pick_tile(extent, unit, max_tile):
    """Pick a block size along one axis.

    Preference order:
      1. the full extent, if it fits the per-block budget (always legal),
      2. the largest multiple of `unit` that divides `extent` (no ragged last
         block -> every DMA and store is full-size),
      3. a near-budget multiple of `unit` (ragged last block, masked by Pallas)
         when the extent isn't unit-divisible or its divisors are tiny.
    """
    if extent <= max_tile:
        return extent
    ragged = max(unit, (max_tile // unit) * unit)
    if extent % unit != 0:
        return ragged
    n_units = extent // unit
    cap = max(1, min(n_units, max_tile // unit))
    best = unit
    for k in range(cap, 0, -1):
        if n_units % k == 0:
            best = k * unit
            break
    # If the best divisor tile is >4x smaller than the budget allows, prefer a
    # near-budget ragged tile (per-step overhead beats one masked edge block).
    if best * 4 < ragged:
        return ragged
    return best


def normalization(img, mean, std):
    """(img - mean) / std with per-channel mean/std, img in NCHW layout."""
    N, C, H, W = img.shape
    dtype = img.dtype

    mean = jnp.asarray(mean, dtype=jnp.float32).reshape(C)
    std = jnp.asarray(std, dtype=jnp.float32).reshape(C)
    # TODO(synk): std == 0 is unguarded (matches the PyTorch module -> inf/nan).
    scale_c = 1.0 / std          # per-channel 1/std, kept in f32
    bias_c = -mean / std         # per-channel -mean/std, kept in f32

    # Lane-dense layout: rows = N*C (per-image-channel), lanes = H*W.
    R = N * C
    L = H * W
    x2d = img.reshape(R, L)
    scale = jnp.tile(scale_c, N).reshape(R, 1)   # f32 (no downcast)
    bias = jnp.tile(bias_c, N).reshape(R, 1)     # f32 (no downcast)

    target_block_bytes, vmem_limit_bytes, parallel_cores = _tpu_tuning()
    itemsize = jnp.dtype(dtype).itemsize
    row_unit = _sublane_unit(dtype)

    # Lane tile first (assuming minimal rows), then grow rows into the budget
    # (handles both big-spatial images and small-spatial / many-channel maps).
    max_l = max(128, target_block_bytes // (row_unit * itemsize))
    tile_l = _pick_tile(L, 128, max_l)
    max_r = max(row_unit, target_block_bytes // (tile_l * itemsize))
    tile_r = _pick_tile(R, row_unit, max_r)

    # On multi-TensorCore chips (v7x), make sure there are >= `parallel_cores`
    # grid steps so no core idles; prefer splitting rows, then lanes.
    if parallel_cores > 1:
        while pl.cdiv(R, tile_r) * pl.cdiv(L, tile_l) < parallel_cores:
            if tile_r > row_unit and R % row_unit == 0:
                tile_r = _pick_tile(R, row_unit, max(row_unit, tile_r // 2))
            elif tile_l > 128 and L % 128 == 0:
                tile_l = _pick_tile(L, 128, max(128, tile_l // 2))
            else:
                break

    grid = (pl.cdiv(R, tile_r), pl.cdiv(L, tile_l))

    out2d = pl.pallas_call(
        _normalize_kernel,
        out_shape=jax.ShapeDtypeStruct((R, L), dtype),
        grid=grid,
        in_specs=[
            pl.BlockSpec((tile_r, tile_l), lambda i, j: (i, j)),
            # scale/bias block index is constant across the inner (lane) grid
            # axis, so Pallas does not re-DMA them every step.
            pl.BlockSpec((tile_r, 1), lambda i, j: (i, 0)),
            pl.BlockSpec((tile_r, 1), lambda i, j: (i, 0)),
        ],
        out_specs=pl.BlockSpec((tile_r, tile_l), lambda i, j: (i, j)),
        compiler_params=pltpu.CompilerParams(
            dimension_semantics=("parallel", "parallel"),
            vmem_limit_bytes=vmem_limit_bytes,
        ),
    )(x2d, scale, bias)

    return out2d.reshape(N, C, H, W)


if __name__ == "__main__":
    key = jax.random.PRNGKey(0)
    N, C, H, W = 2, 4, 16, 16
    img = jax.random.uniform(key, (N, C, H, W), dtype=jnp.float32)

    # Deterministic per-channel normalization constants (ImageNet-like + padding).
    mean = [0.485, 0.456, 0.406, 0.5][:C]
    std = [0.229, 0.224, 0.225, 0.25][:C]

    out = normalization(img, mean, std)
    out = jax.block_until_ready(out)

    # Reference: plain JAX broadcasting, matching the PyTorch module semantics.
    ref = (img - jnp.asarray(mean, jnp.float32).reshape(1, C, 1, 1)) / \
        jnp.asarray(std, jnp.float32).reshape(1, C, 1, 1)
    assert out.shape == (N, C, H, W)
    assert out.dtype == jnp.float32
    # Scale/bias folding (x*(1/std) + (-mean/std)) rounds slightly differently
    # than (x-mean)/std, so use a marginally looser tolerance than exact f32.
    assert jnp.allclose(out, ref, atol=1e-5, rtol=1e-5)

    print("KERNEL_OK")
</pallas_src>

<mosaic_0001>
module attributes {stable_mosaic.version = 11 : i64} {
  func.func @_normalize_kernel(%arg0: i32, %arg1: i32, %arg2: memref<8x256xf32, #tpu.memory_space<vmem>>, %arg3: memref<8x1xf32, #tpu.memory_space<vmem>>, %arg4: memref<8x1xf32, #tpu.memory_space<vmem>>, %arg5: memref<8x256xf32, #tpu.memory_space<vmem>>) attributes {dimension_semantics = [#tpu.dimension_semantics<parallel>, #tpu.dimension_semantics<parallel>], iteration_bounds = array<i64: 1, 1>, scalar_prefetch = 0 : i64, scratch_operands = 0 : i64, tpu.core_type = #tpu.core_type<tc>, window_params = [{transform_indices = @transform_0, window_bounds = array<i64: 8, 256>}, {transform_indices = @transform_1, window_bounds = array<i64: 8, 1>}, {transform_indices = @transform_2, window_bounds = array<i64: 8, 1>}, {transform_indices = @transform_3, window_bounds = array<i64: 8, 256>}]} {
    %c0 = arith.constant 0 : index
    %c0_0 = arith.constant 0 : index
    %0 = vector.load %arg2[%c0, %c0_0] : memref<8x256xf32, #tpu.memory_space<vmem>>, vector<8x256xf32>
    %c0_1 = arith.constant 0 : index
    %c0_2 = arith.constant 0 : index
    %1 = vector.load %arg3[%c0_1, %c0_2] : memref<8x1xf32, #tpu.memory_space<vmem>>, vector<8x1xf32>
    %2 = vector.broadcast %1 : vector<8x1xf32> to vector<8x256xf32>
    %3 = arith.mulf %0, %2 : vector<8x256xf32>
    %c0_3 = arith.constant 0 : index
    %c0_4 = arith.constant 0 : index
    %4 = vector.load %arg4[%c0_3, %c0_4] : memref<8x1xf32, #tpu.memory_space<vmem>>, vector<8x1xf32>
    %5 = vector.broadcast %4 : vector<8x1xf32> to vector<8x256xf32>
    %6 = arith.addf %3, %5 : vector<8x256xf32>
    %c0_5 = arith.constant 0 : index
    %c0_6 = arith.constant 0 : index
    %7 = vector.load %arg5[%c0_5, %c0_6] : memref<8x256xf32, #tpu.memory_space<vmem>>, vector<8x256xf32>
    tpu.vector_store %arg5[%c0_5, %c0_6], %6 {strides = array<i32>} : memref<8x256xf32, #tpu.memory_space<vmem>>, vector<8x256xf32>,
    return
  }
  func.func @transform_0(%arg0: i32, %arg1: i32) -> (i32, i32) {
    %c0_i32 = arith.constant 0 : i32
    return %arg0, %arg1 : i32, i32
  }
  func.func @transform_1(%arg0: i32, %arg1: i32) -> (i32, i32) {
    %c0_i32 = arith.constant 0 : i32
    %c0_i32_0 = arith.constant 0 : i32
    return %arg0, %c0_i32 : i32, i32
  }
  func.func @transform_2(%arg0: i32, %arg1: i32) -> (i32, i32) {
    %c0_i32 = arith.constant 0 : i32
    %c0_i32_0 = arith.constant 0 : i32
    return %arg0, %c0_i32 : i32, i32
  }
  func.func @transform_3(%arg0: i32, %arg1: i32) -> (i32, i32) {
    %c0_i32 = arith.constant 0 : i32
    return %arg0, %arg1 : i32, i32
  }
}

</mosaic_0001>

<bundles_post_ra>
// kernel: tpu_custom_call.1
= control target key start
LH: loop header
LB: loop body
LE: loop exit
PB: predicated region body
PF: predicated region fallthrough
CT: control target
= control target key end

     0   :  { %s122_s0 = inlined_call_operand.vmem [shape: f32[8,256], index: 0, kind: input, shape index: {}]   ;;  %s123_s1 = inlined_call_operand.vmem [shape: f32[8,1], index: 1, kind: input, shape index: {}]   ;;  %s124_s2 = inlined_call_operand.vmem [shape: f32[8,1], index: 2, kind: input, shape index: {}]   ;;  %s125_s3 = inlined_call_operand.hbm [shape: f32[8,256], index: 3, kind: output, shape index: {}]  }
   0x1   :  { %v17_v0 = vld [vmem:[%s123_s1] sm:$0xff] }
   0x2   :  { %8 = vsyncpa [#allocation3], 0  ;;  %v76_v1 = vmov 0   ;;  %v25_v2 = vld [vmem:[%s124_s2] sm:$0xff]  ;;  %v16_v5 = vld [vmem:[%s122_s0 + $0x8] sm:$0xff]  ;;  %s77_s20 = smov [#allocation2]  }
   0x3   :  { %51 = vset.pattern.permute.xlu0 %v76_v1  ;;  %v15_v4 = vld [vmem:[%s122_s0] sm:$0xff]  ;;  %s41_s1 = sshll.u32 %s77_s20, 4  ;;  %s42_s1 = int_to_ptr.vmem [resolvable:$true] %s41_s1 }
   0x4   :  { %20 = vperm.xlu0 %51, %v17_v0   ;;  %s52_s2 = scalar_lea.vmem %s42_s1, 256  ;;  %p57_p1 = scmp.lt.s32.totalorder %s42_s1, %s42_s1 }
   0x5   :  { %p53_p0 = scmp.ne.s32.totalorder %s42_s1, %s52_s2  ;;  %p58_p2 = scmp.lt.s32.totalorder %s52_s2, %s52_s2 }
   0x7   :  { %p59_p3 = por %p58_p2, %p57_p1 }
   0x8   :  { %28 = vperm.xlu0 %51, %v25_v2  }
   0x9   :  { %p60_p4 = pnand %p59_p3, %p53_p0 }
  0x83   :  { %v21_v3 = vpop.permute.xlu0 %20 }
  0x84   :  { %v23_v6 = vmul.f32 %v21_v3, %v15_v4  ;;  %v24_v7 = vmul.f32 %v21_v3, %v16_v5 }
  0x87   :  { %v29_v8 = vpop.permute.xlu0 %28 }
  0x88   :  { %v31_v9 = vadd.f32 %v29_v8, %v23_v6  ;;  %v32_v10 = vadd.f32 %v29_v8, %v24_v7 }
  0x8a   :  { %33 = vst [vmem:[#allocation2] sm:$0xff] %v31_v9  ;;  %34 = vst [vmem:[#allocation2 + $0x8] sm:$0xff] %v32_v10 }
  0x8b   :  { %63 = shalt.err (!%p60_p4)
}
  0x8c   :  { %s64_s0 = scalar_lea.hbm %s125_s3, 256 }
  0x8d   :  { %p65_p5 = scmp.ne.s32.totalorder %s125_s3, %s64_s0  ;;  %p68_p6 = scmp.lt.u32.totalorder %s64_s0, %s125_s3 }
  0x8f   :  { %p70_p7 = pnand %p68_p6, %p65_p5 }
  0x91   :  { %73 = shalt.err (!%p70_p7)
}
  0x92   :  { %44 = dma.vmem_to_hbm [thread:$0]  %s42_s1, 256, %s125_s3, [#allocation3]  }
  0x93   :  { %74 = dma.done.wait [#allocation3], 256  }
  0x94   :  { %75 = vsyncadd [#allocation3], 4294967040 }
  0x95   :  { %48 = vsyncpa [#allocation3], 1 }

</bundles_post_ra>
